<compile_context>
chip_gen: v7x
topology: tpu7x:2x2x1
jax: 0.10.0
libtpu: 0.0.40
codegen_flags: <defaults>
</compile_context>

<pallas_src>
import functools
import math

import jax
import jax.numpy as jnp
from jax import lax
from jax.experimental import pallas as pl
from jax.experimental.pallas import tpu as pltpu


def _round_up(x: int, m: int) -> int:
    return (x + m - 1) // m * m


def _round_down(x: int, m: int) -> int:
    return (x // m) * m


def _lse_pool_kernel(x_ref, o_ref, m_acc, s_acc, *, factor, hw, chunk,
                     num_chunks):
    """One (rows, chunk) tile.  Grid = (row_blocks, num_chunks)."""
    k = pl.program_id(1)
    x = x_ref[...].astype(jnp.float32)            # (rows, chunk)

    log_hw = math.log(float(hw))
    padded = (num_chunks * chunk) > hw            # trace-time bool

    def scaled(v):                                # trace-time factor fold
        return v if factor == 1.0 else v * factor

    if padded:
        lane = lax.broadcasted_iota(jnp.int32, x.shape, 1) + k * chunk
        valid = lane < hw
        x_for_max = jnp.where(valid, x, -jnp.inf)
    else:
        valid = None
        x_for_max = x

    # Per-row max over this chunk (lane reduce).
    lm = jnp.max(x_for_max, axis=-1, keepdims=True)          # (rows, 1)

    if num_chunks == 1:
        # Fast path: whole H*W in one chunk, no online accumulation needed.
        p = jnp.exp(scaled(x - lm))
        if valid is not None:
            p = jnp.where(valid, p, 0.0)
        s = jnp.sum(p, axis=-1, keepdims=True)                # (rows, 1)
        log_mean = jnp.log(s) - log_hw
        if factor != 1.0:
            log_mean = log_mean / factor
        o_ref[...] = (lm + log_mean).astype(o_ref.dtype)
    else:
        # Online LSE across HW chunks (running max + rescaled running sum).
        @pl.when(k == 0)
        def _init():
            m_acc[...] = lm                       # finite init (first chunk max)
            s_acc[...] = jnp.zeros_like(s_acc)

        m_old = m_acc[...]
        m_new = jnp.maximum(m_old, lm)

        p = jnp.exp(scaled(x - m_new))
        if valid is not None:
            p = jnp.where(valid, p, 0.0)
        chunk_sum = jnp.sum(p, axis=-1, keepdims=True)

        s_acc[...] = s_acc[...] * jnp.exp(scaled(m_old - m_new)) + chunk_sum
        m_acc[...] = m_new

        @pl.when(k == num_chunks - 1)
        def _finalize():
            log_mean = jnp.log(s_acc[...]) - log_hw
            if factor != 1.0:
                log_mean = log_mean / factor
            o_ref[...] = (m_acc[...] + log_mean).astype(o_ref.dtype)


def _choose_tiling(nc: int, hw: int, itemsize: int, target_bytes: int):
    """Pick (rows, chunk, num_chunks) so one input block is ~target_bytes."""
    sub = 8 * max(1, 4 // itemsize)               # sublane granularity per dtype
    lane_bytes = _round_up(hw, 128) * itemsize    # VMEM bytes per row (lane-padded)

    if sub * lane_bytes <= target_bytes:
        # Whole H*W fits per row: only block over rows (no HW chunking).
        chunk, num_chunks = hw, 1
        rows = max(_round_down(target_bytes // lane_bytes, sub), sub)
    else:
        # Large feature map: tile HW (online-LSE path).
        rows = min(_round_up(nc, sub), 256)
        chunk = max(_round_down(target_bytes // (rows * itemsize), 128), 128)
        chunk = min(chunk, _round_up(hw, 128))
        num_chunks = pl.cdiv(hw, chunk)

    if rows >= nc:
        rows = nc          # single row block: full-dim block (any size allowed)
    return rows, chunk, num_chunks


def logsumexp_pool2d(x, factor: float = 1.0, *,
                     target_block_bytes: int = 4 * 1024 * 1024):
    """Pallas implementation of LogSumExpPool2d.forward.

    Args:
      x: (N, C, H, W) array.
      factor: temperature factor.
      target_block_bytes: approximate per-input-block VMEM budget.
    Returns:
      (N, C, 1, 1) array, same dtype as x.
    """
    N, C, H, W = x.shape
    hw = H * W
    nc = N * C
    itemsize = jnp.dtype(x.dtype).itemsize

    xf = x.reshape(nc, hw)
    rows, chunk, num_chunks = _choose_tiling(nc, hw, itemsize,
                                             target_block_bytes)
    num_row_blocks = pl.cdiv(nc, rows)

    kernel = functools.partial(_lse_pool_kernel, factor=float(factor), hw=hw,
                               chunk=chunk, num_chunks=num_chunks)

    out = pl.pallas_call(
        kernel,
        out_shape=jax.ShapeDtypeStruct((nc, 1), x.dtype),
        grid_spec=pltpu.PrefetchScalarGridSpec(
            num_scalar_prefetch=0,
            grid=(num_row_blocks, num_chunks),
            in_specs=[pl.BlockSpec((rows, chunk), lambda i, k: (i, k))],
            out_specs=pl.BlockSpec((rows, 1), lambda i, k: (i, 0)),
            scratch_shapes=[pltpu.VMEM((rows, 1), jnp.float32),
                            pltpu.VMEM((rows, 1), jnp.float32)],
        ),
        compiler_params=pltpu.CompilerParams(
            dimension_semantics=("parallel", "arbitrary"),
            vmem_limit_bytes=32 * 1024 * 1024,
        ),
    )(xf)

    return out.reshape(N, C, 1, 1)


def _reference(x, factor: float = 1.0):
    # Pure-JAX reference mirroring the PyTorch module exactly.
    _, _, H, W = x.shape
    max_pool = jnp.max(x, axis=(2, 3), keepdims=True)
    exp = jnp.exp(factor * (x - max_pool))
    sumexp = jnp.sum(exp, axis=(2, 3), keepdims=True) / (H * W)
    return max_pool + jnp.log(sumexp) / factor


def _check(x, factor, **kwargs):
    out = jax.block_until_ready(logsumexp_pool2d(x, factor=factor, **kwargs))
    ref = _reference(x, factor=factor)
    assert out.shape == ref.shape, (out.shape, ref.shape)
    err = float(jnp.max(jnp.abs(out - ref)))
    assert jnp.allclose(out, ref, atol=1e-5, rtol=1e-5), err
    return out


if __name__ == "__main__":
    key = jax.random.PRNGKey(0)

    # Primary case (module's NCHW conv-feature input): single-chunk fast path.
    N, C, H, W = 2, 4, 16, 16
    x = jax.random.normal(key, (N, C, H, W), dtype=jnp.float32)
    _check(x, factor=1.0)

    # Online-LSE chunked-HW path (forced via a small block budget), factor != 1.
    x2 = jax.random.normal(jax.random.PRNGKey(1), (2, 4, 64, 64), jnp.float32)
    _check(x2, factor=0.5, target_block_bytes=64 * 1024)

    # Chunked path with HW padding (60*60 not a multiple of the 128-lane chunk).
    x3 = jax.random.normal(jax.random.PRNGKey(2), (2, 4, 60, 60), jnp.float32)
    _check(x3, factor=1.0, target_block_bytes=64 * 1024)

    # Odd small shapes (nc and hw not (8,128)-aligned): full-dim blocks.
    x4 = jax.random.normal(jax.random.PRNGKey(3), (2, 3, 7, 7), jnp.float32)
    _check(x4, factor=2.0)

    print("KERNEL_OK")
</pallas_src>

<mosaic_0001>
module attributes {stable_mosaic.version = 11 : i64} {
  func.func @_lse_pool_kernel(%arg0: i32, %arg1: i32, %arg2: memref<8x256xf32, #tpu.memory_space<vmem>>, %arg3: memref<8x1xf32, #tpu.memory_space<vmem>>, %arg4: memref<8x1xf32, #tpu.memory_space<vmem>>, %arg5: memref<8x1xf32, #tpu.memory_space<vmem>>) attributes {dimension_semantics = [#tpu.dimension_semantics<parallel>, #tpu.dimension_semantics<arbitrary>], iteration_bounds = array<i64: 1, 1>, scalar_prefetch = 0 : i64, scratch_operands = 2 : i64, tpu.core_type = #tpu.core_type<tc>, window_params = [{transform_indices = @transform_0, window_bounds = array<i64: 8, 256>}, {transform_indices = @transform_1, window_bounds = array<i64: 8, 1>}]} {
    %c0 = arith.constant 0 : index
    %c0_0 = arith.constant 0 : index
    %0 = vector.load %arg2[%c0, %c0_0] : memref<8x256xf32, #tpu.memory_space<vmem>>, vector<8x256xf32>
    %cst = arith.constant dense<0xFF800000> : vector<8xf32>
    %1 = vector.multi_reduction <maximumf>, %0, %cst [1] : vector<8x256xf32> to vector<8xf32>
    %2 = vector.shape_cast %1 : vector<8xf32> to vector<8x1xf32>
    %3 = vector.broadcast %2 : vector<8x1xf32> to vector<8x256xf32>
    %4 = arith.subf %0, %3 : vector<8x256xf32>
    %5 = math.exp %4 : vector<8x256xf32>
    %cst_1 = arith.constant dense<0.000000e+00> : vector<8xf32>
    %6 = vector.multi_reduction <add>, %5, %cst_1 [1] : vector<8x256xf32> to vector<8xf32>
    %7 = vector.shape_cast %6 : vector<8xf32> to vector<8x1xf32>
    %8 = math.log %7 : vector<8x1xf32>
    %cst_2 = arith.constant 5.54517746 : f32
    %9 = vector.broadcast %cst_2 : f32 to vector<8x1xf32>
    %10 = arith.subf %8, %9 : vector<8x1xf32>
    %11 = arith.addf %2, %10 : vector<8x1xf32>
    %c0_3 = arith.constant 0 : index
    %c0_4 = arith.constant 0 : index
    %12 = vector.load %arg3[%c0_3, %c0_4] : memref<8x1xf32, #tpu.memory_space<vmem>>, vector<8x1xf32>
    tpu.vector_store %arg3[%c0_3, %c0_4], %11 {strides = array<i32>} : memref<8x1xf32, #tpu.memory_space<vmem>>, vector<8x1xf32>,
    return
  }
  func.func @transform_0(%arg0: i32, %arg1: i32) -> (i32, i32) {
    %c0_i32 = arith.constant 0 : i32
    return %arg0, %arg1 : i32, i32
  }
  func.func @transform_1(%arg0: i32, %arg1: i32) -> (i32, i32) {
    %c0_i32 = arith.constant 0 : i32
    %c0_i32_0 = arith.constant 0 : i32
    return %arg0, %c0_i32 : i32, i32
  }
}

</mosaic_0001>

<bundles_post_ra>
// kernel: tpu_custom_call.1
= control target key start
LH: loop header
LB: loop body
LE: loop exit
PB: predicated region body
PF: predicated region fallthrough
CT: control target
= control target key end

     0   :  { %6 = vsyncpa [#allocation5], 0  ;;  %s77_s6 = smov [#allocation4]   ;;  %s103_s0 = inlined_call_operand.hbm [shape: f32[8,256], index: 0, kind: input, shape index: {}]   ;;  %s104_s1 = inlined_call_operand.vmem [shape: f32[8,1], index: 1, kind: output, shape index: {}]  }
   0x1   :  { %s13_s7 = sshll.u32 %s77_s6, 4  ;;  %s53_s10 = scalar_lea.hbm %s103_s0, 256  ;;  %s14_s7 = int_to_ptr.vmem [resolvable:$true] %s13_s7 }
   0x2   :  { %p54_p0 = scmp.ne.s32.totalorder %s103_s0, %s53_s10  ;;  %p57_p1 = scmp.lt.u32.totalorder %s53_s10, %s103_s0 }
   0x4   :  { %p59_p2 = pnand %p57_p1, %p54_p0 }
   0x6   :  { %62 = shalt.err (!%p59_p2)
}
   0x7   :  { %s63_s15 = scalar_lea.vmem %s14_s7, 256  ;;  %p68_p4 = scmp.lt.s32.totalorder %s14_s7, %s14_s7 }
   0x8   :  { %p64_p3 = scmp.ne.s32.totalorder %s14_s7, %s63_s15  ;;  %p69_p5 = scmp.lt.s32.totalorder %s63_s15, %s63_s15 }
   0xa   :  { %p70_p6 = por %p69_p5, %p68_p4 }
   0xc   :  { %p71_p7 = pnand %p70_p6, %p64_p3 }
   0xe   :  { %74 = shalt.err (!%p71_p7)
}
   0xf   :  { %16 = dma.hbm_to_vmem [thread:$0]  %s103_s0, 256, %s14_s7, [#allocation5]  }
  0x10   :  { %75 = dma.done.wait [#allocation5], 256  }
  0x11   :  { %76 = vsyncadd [#allocation5], 4294967040  ;;  %v20_v0 = vld [vmem:[#allocation4] sm:$0xff]  ;;  %v21_v1 = vld [vmem:[#allocation4 + $0x8] sm:$0xff]  ;;  %vm38_vm0 = vcmask 7168  }
  0x12   :  { %v22_v2 = vmax.f32 %v20_v0, %v21_v1 }
  0x14   :  { %23 = vmax.xlane.f32.xlu0 %v22_v2 }
  0xa1   :  { %v24_v3 = vpop.xlane.xlu0 %23 }
  0xa2   :  { %v25_v4 = vsub.f32 %v20_v0, %v24_v3  ;;  %v26_v5 = vsub.f32 %v21_v1, %v24_v3 }
  0xa4   :  { %v27_v6 = vmul.f32 1.442695, %v25_v4  ;;  %v29_v7 = vmul.f32 1.442695, %v26_v5 }
  0xa6   :  { %47 = vpow2.f32 %v27_v6 }
  0xa7   :  { %49 = vpow2.f32 %v29_v7 }
  0xb0   :  { %v48_v8 = vpop.eup %47 }
  0xb1   :  { %v50_v9 = vpop.eup %49 }
  0xb2   :  { %v31_v10 = vadd.f32 %v50_v9, %v48_v8 }
  0xb4   :  { %32 = vadd.xlane.f32.xlu0 %v31_v10 }
 0x141   :  { %v33_v11 = vpop.xlane.xlu0 %32 }
 0x142   :  { %51 = vlog2.f32 %v33_v11 }
 0x14c   :  { %v52_v12 = vpop.eup %51 }
 0x14d   :  { %v35_v13 = vmul.f32 0.6931472, %v52_v12 }
 0x14f   :  { %v45_v14 = vadd.f32 -5.5451775, %v35_v13 }
 0x151   :  { %v37_v15 = vadd.f32 %v45_v14, %v24_v3 }
 0x153   :  { %39 = vst.msk [vmem:[%s104_s1] sm:$0xff] %vm38_vm0, %v37_v15 }
 0x154   :  { %44 = vsyncpa [#allocation5], 1 }

</bundles_post_ra>
